<compile_context>
chip_gen: v7x
topology: tpu7x:2x2x1
jax: 0.10.0
libtpu: 0.0.40
codegen_flags: <defaults>
</compile_context>

<pallas_src>
import functools

import jax
import jax.numpy as jnp
from jax.experimental import pallas as pl
from jax.experimental.pallas import tpu as pltpu


def _round_up(a: int, b: int) -> int:
    return ((a + b - 1) // b) * b


def _vmem_limit_bytes(working_set_bytes: int) -> int:
    """Generation-aware scoped-VMEM request with headroom for compiler scratch."""
    try:
        phys = int(pltpu.get_tpu_info().vmem_capacity_bytes)
    except Exception:  # pragma: no cover - conservative (v7x-sized) fallback
        phys = 64 << 20
    # ~44 MiB on v7x's 64 MiB, up to ~100 MiB on v5e/v6e's 128 MiB parts.
    cap = min(int(phys * 0.70), 100 << 20)
    want = max(int(working_set_bytes) + (8 << 20), 32 << 20)
    return int(min(want, cap))


# ----------------------------------------------------------------------------
# Kernels
# ----------------------------------------------------------------------------
def _linear_relu_kernel_single(x_ref, w_ref, b_ref, o_ref):
    # x: (tm, tk)  w: (tk, tn)  b: (1, tn)  o: (tm, tn) -- whole K in one step.
    y = jnp.dot(x_ref[...], w_ref[...], preferred_element_type=jnp.float32)
    y = y + b_ref[...].astype(jnp.float32)
    o_ref[...] = jnp.maximum(y, 0.0).astype(o_ref.dtype)


def _linear_relu_kernel_acc(x_ref, w_ref, b_ref, o_ref, acc_ref):
    # x: (tm, tk)  w: (tk, tn)  b: (1, tn)  o: (tm, tn)
    # acc_ref: (tm, tn) f32 scratch, persists across the (innermost) k axis.
    k = pl.program_id(2)
    partial = jnp.dot(x_ref[...], w_ref[...], preferred_element_type=jnp.float32)

    @pl.when(k == 0)
    def _first():
        acc_ref[...] = partial          # direct write: no zero-fill + extra add

    @pl.when(k > 0)
    def _rest():
        acc_ref[...] += partial

    @pl.when(k == pl.num_programs(2) - 1)
    def _finalize():
        y = acc_ref[...] + b_ref[...].astype(jnp.float32)
        o_ref[...] = jnp.maximum(y, 0.0).astype(o_ref.dtype)


# ----------------------------------------------------------------------------
# One-time parameter preparation (do this at parameter setup, not per forward)
# ----------------------------------------------------------------------------
def prepare_linear_params(weight, bias, *, tn=512, tk=1024):
    """Transpose PyTorch-convention weight (c_out, c_in) to the MXU-natural
    [K, N] layout and zero-pad weight/bias to tile multiples. Returns
    (w_kn, b_row, c_out)."""
    c_out, c_in = weight.shape
    tn = min(tn, _round_up(c_out, 128))
    tk = min(tk, _round_up(c_in, 128))
    n_pad = _round_up(c_out, tn)
    k_pad = _round_up(c_in, tk)

    w_kn = weight.T                                   # (c_in, c_out) == [K, N]
    if (k_pad, n_pad) != (c_in, c_out):
        w_kn = jnp.pad(w_kn, ((0, k_pad - c_in), (0, n_pad - c_out)))
    b_row = bias.reshape(1, c_out)
    if n_pad != c_out:
        b_row = jnp.pad(b_row, ((0, 0), (0, n_pad - c_out)))
    return w_kn, b_row, c_out


# ----------------------------------------------------------------------------
# Forward: relu(x @ W^T + b)
# ----------------------------------------------------------------------------
def linear_relu(x, w_kn, b_row, *, c_out, tm=512, tn=512, tk=1024,
                compute_dtype=None):
    """Pallas equivalent of F.relu(nn.Linear(c_in, c_out)(x)).

    x:     (..., c_in)
    w_kn:  (k_pad, n_pad)  -- output of prepare_linear_params (already [K, N])
    b_row: (1, n_pad)
    compute_dtype: optionally jnp.bfloat16 for faster MXU / less HBM traffic
                   (accumulation stays f32).
    """
    k_pad, n_pad = w_kn.shape
    lead_shape = x.shape[:-1]
    c_in = x.shape[-1]
    m = 1
    for d in lead_shape:
        m *= d
    x2d = x.reshape(m, c_in)

    tn = min(tn, n_pad)
    tk = min(tk, k_pad)
    tm = min(tm, _round_up(m, 8))
    assert n_pad % tn == 0 and k_pad % tk == 0, "tile sizes must match prepare_linear_params"

    m_pad = _round_up(m, tm)
    if (m_pad, k_pad) != (m, c_in):
        x2d = jnp.pad(x2d, ((0, m_pad - m), (0, k_pad - c_in)))

    out_dtype = x.dtype
    if compute_dtype is not None:
        x2d = x2d.astype(compute_dtype)
        w_kn = w_kn.astype(compute_dtype)
    itemsize = jnp.dtype(x2d.dtype).itemsize

    n_k_steps = k_pad // tk
    if n_k_steps == 1:
        # Fast path: whole reduction in one step -> no K axis, no accumulator.
        grid = (m_pad // tm, n_pad // tn)
        in_specs = [
            pl.BlockSpec((tm, tk), lambda i, j: (i, 0)),   # x
            pl.BlockSpec((tk, tn), lambda i, j: (0, j)),   # W in [K, N] layout
            pl.BlockSpec((1, tn), lambda i, j: (0, j)),    # bias
        ]
        out_specs = pl.BlockSpec((tm, tn), lambda i, j: (i, j))
        scratch = []
        kernel = _linear_relu_kernel_single
        dims = ("parallel", "parallel")
        working = 2 * (tm * tk + tk * tn + tn + tm * tn) * itemsize
    else:
        grid = (m_pad // tm, n_pad // tn, n_k_steps)
        in_specs = [
            pl.BlockSpec((tm, tk), lambda i, j, k: (i, k)),   # x
            pl.BlockSpec((tk, tn), lambda i, j, k: (k, j)),   # W in [K, N] layout
            pl.BlockSpec((1, tn), lambda i, j, k: (0, j)),    # bias
        ]
        out_specs = pl.BlockSpec((tm, tn), lambda i, j, k: (i, j))
        scratch = [pltpu.VMEM((tm, tn), jnp.float32)]
        kernel = _linear_relu_kernel_acc
        dims = ("parallel", "parallel", "arbitrary")       # keep reduction last
        working = (2 * (tm * tk + tk * tn + tn + tm * tn) * itemsize
                   + tm * tn * 4)

    out2d = pl.pallas_call(
        kernel,
        out_shape=jax.ShapeDtypeStruct((m_pad, n_pad), out_dtype),
        grid_spec=pltpu.PrefetchScalarGridSpec(
            num_scalar_prefetch=0,
            grid=grid,
            in_specs=in_specs,
            out_specs=out_specs,
            scratch_shapes=scratch,
        ),
        compiler_params=pltpu.CompilerParams(
            dimension_semantics=dims,
            vmem_limit_bytes=_vmem_limit_bytes(working),
        ),
    )(x2d, w_kn, b_row)

    out2d = out2d[:m, :c_out]
    return out2d.reshape(*lead_shape, c_out)


if __name__ == "__main__":
    key = jax.random.PRNGKey(0)
    k_x, k_w, k_b, k_x2, k_w2, k_b2 = jax.random.split(key, 6)

    # --- test 1: GCN-sized shapes (single-K fast path) ------------------------
    B, S, C_IN, C_OUT = 2, 8, 32, 32
    x = jax.random.normal(k_x, (B, S, C_IN), dtype=jnp.float32)
    bound = 1.0 / (C_IN ** 0.5)
    weight = jax.random.uniform(k_w, (C_OUT, C_IN), minval=-bound, maxval=bound,
                                dtype=jnp.float32)
    bias = jax.random.uniform(k_b, (C_OUT,), minval=-bound, maxval=bound,
                              dtype=jnp.float32)

    w_kn, b_row, _ = prepare_linear_params(weight, bias)   # one-time param prep
    fwd = jax.jit(functools.partial(linear_relu, c_out=C_OUT))
    out = jax.block_until_ready(fwd(x, w_kn, b_row))

    ref = jnp.maximum(jnp.einsum("bsc,oc->bso", x, weight) + bias, 0.0)
    assert out.shape == (B, S, C_OUT)
    assert jnp.allclose(out, ref, atol=1e-5, rtol=1e-5)

    # --- test 2: force the multi-K accumulator path (small tiles) --------------
    C_IN2, C_OUT2 = 256, 64
    x2 = jax.random.normal(k_x2, (B, S, C_IN2), dtype=jnp.float32)
    bound2 = 1.0 / (C_IN2 ** 0.5)
    weight2 = jax.random.uniform(k_w2, (C_OUT2, C_IN2), minval=-bound2,
                                 maxval=bound2, dtype=jnp.float32)
    bias2 = jax.random.uniform(k_b2, (C_OUT2,), minval=-bound2, maxval=bound2,
                               dtype=jnp.float32)

    w_kn2, b_row2, _ = prepare_linear_params(weight2, bias2, tn=128, tk=128)
    fwd2 = jax.jit(functools.partial(linear_relu, c_out=C_OUT2, tn=128, tk=128))
    out2 = jax.block_until_ready(fwd2(x2, w_kn2, b_row2))

    ref2 = jnp.maximum(jnp.einsum("bsc,oc->bso", x2, weight2) + bias2, 0.0)
    assert out2.shape == (B, S, C_OUT2)
    assert jnp.allclose(out2, ref2, atol=1e-4, rtol=1e-4)

    print("KERNEL_OK")
</pallas_src>

<mosaic_0001>
module attributes {stable_mosaic.version = 11 : i64} {
  func.func @_linear_relu_kernel_single(%arg0: i32, %arg1: i32, %arg2: memref<16x128xf32, #tpu.memory_space<vmem>>, %arg3: memref<128x128xf32, #tpu.memory_space<vmem>>, %arg4: memref<1x128xf32, #tpu.memory_space<vmem>>, %arg5: memref<16x128xf32, #tpu.memory_space<vmem>>) attributes {dimension_semantics = [#tpu.dimension_semantics<parallel>, #tpu.dimension_semantics<parallel>], iteration_bounds = array<i64: 1, 1>, scalar_prefetch = 0 : i64, scratch_operands = 0 : i64, tpu.core_type = #tpu.core_type<tc>, window_params = [{transform_indices = @transform_0, window_bounds = array<i64: 16, 128>}, {transform_indices = @transform_1, window_bounds = array<i64: 128, 128>}, {transform_indices = @transform_2, window_bounds = array<i64: 1, 128>}, {transform_indices = @transform_3, window_bounds = array<i64: 16, 128>}]} {
    %c0 = arith.constant 0 : index
    %c0_0 = arith.constant 0 : index
    %0 = vector.load %arg2[%c0, %c0_0] : memref<16x128xf32, #tpu.memory_space<vmem>>, vector<16x128xf32>
    %c0_1 = arith.constant 0 : index
    %c0_2 = arith.constant 0 : index
    %1 = vector.load %arg3[%c0_1, %c0_2] : memref<128x128xf32, #tpu.memory_space<vmem>>, vector<128x128xf32>
    %cst = arith.constant dense<0.000000e+00> : vector<16x128xf32>
    %2 = tpu.matmul %0, %1, %cst {dimension_numbers = #tpu.dot_dimension_numbers<[1], [0], [0], [1], [0, 0, 1, 1], [], []>} : vector<16x128xf32>, vector<128x128xf32>, vector<16x128xf32> -> vector<16x128xf32>
    %c0_3 = arith.constant 0 : index
    %c0_4 = arith.constant 0 : index
    %3 = vector.load %arg4[%c0_3, %c0_4] : memref<1x128xf32, #tpu.memory_space<vmem>>, vector<1x128xf32>
    %4 = vector.broadcast %3 : vector<1x128xf32> to vector<16x128xf32>
    %5 = arith.addf %2, %4 : vector<16x128xf32>
    %cst_5 = arith.constant 0.000000e+00 : f32
    %6 = vector.broadcast %cst_5 : f32 to vector<16x128xf32>
    %7 = arith.maximumf %5, %6 : vector<16x128xf32>
    %c0_6 = arith.constant 0 : index
    %c0_7 = arith.constant 0 : index
    %8 = vector.load %arg5[%c0_6, %c0_7] : memref<16x128xf32, #tpu.memory_space<vmem>>, vector<16x128xf32>
    tpu.vector_store %arg5[%c0_6, %c0_7], %7 {strides = array<i32>} : memref<16x128xf32, #tpu.memory_space<vmem>>, vector<16x128xf32>,
    return
  }
  func.func @transform_0(%arg0: i32, %arg1: i32) -> (i32, i32) {
    %c0_i32 = arith.constant 0 : i32
    %c0_i32_0 = arith.constant 0 : i32
    return %arg0, %c0_i32 : i32, i32
  }
  func.func @transform_1(%arg0: i32, %arg1: i32) -> (i32, i32) {
    %c0_i32 = arith.constant 0 : i32
    %c0_i32_0 = arith.constant 0 : i32
    return %c0_i32, %arg1 : i32, i32
  }
  func.func @transform_2(%arg0: i32, %arg1: i32) -> (i32, i32) {
    %c0_i32 = arith.constant 0 : i32
    %c0_i32_0 = arith.constant 0 : i32
    return %c0_i32, %arg1 : i32, i32
  }
  func.func @transform_3(%arg0: i32, %arg1: i32) -> (i32, i32) {
    %c0_i32 = arith.constant 0 : i32
    return %arg0, %arg1 : i32, i32
  }
}

</mosaic_0001>

<bundles_post_ra>
// kernel: linear_relu.1
= control target key start
LH: loop header
LB: loop body
LE: loop exit
PB: predicated region body
PF: predicated region fallthrough
CT: control target
= control target key end

     0   :  { %8 = vsyncpa [#allocation3], 0  ;;  %s250_s12 = smov [#allocation2]   ;;  %s300_s0 = inlined_call_operand.vmem [shape: f32[16,128], index: 0, kind: input, shape index: {}]   ;;  %s301_s1 = inlined_call_operand.hbm [shape: f32[128,128], index: 1, kind: input, shape index: {}]   ;;  %s302_s2 = inlined_call_operand.vmem [shape: f32[1,128], index: 2, kind: input, shape index: {}]   ;;  %s303_s3 = inlined_call_operand.vmem [shape: f32[16,128], index: 3, kind: output, shape index: {}]  }
   0x1   :  { %s16_s13 = sshll.u32 %s250_s12, 4  ;;  %s226_s16 = scalar_lea.hbm %s301_s1, 2048  ;;  %s17_s13 = int_to_ptr.vmem [resolvable:$true] %s16_s13 }
   0x2   :  { %p227_p0 = scmp.ne.s32.totalorder %s301_s1, %s226_s16  ;;  %p230_p1 = scmp.lt.u32.totalorder %s226_s16, %s301_s1 }
   0x4   :  { %p232_p2 = pnand %p230_p1, %p227_p0 }
   0x6   :  { %235 = shalt.err (!%p232_p2)
}
   0x7   :  { %s236_s21 = scalar_lea.vmem %s17_s13, 2048  ;;  %p241_p4 = scmp.lt.s32.totalorder %s17_s13, %s17_s13 }
   0x8   :  { %p237_p3 = scmp.ne.s32.totalorder %s17_s13, %s236_s21  ;;  %p242_p5 = scmp.lt.s32.totalorder %s236_s21, %s236_s21 }
   0xa   :  { %p243_p6 = por %p242_p5, %p241_p4 }
   0xc   :  { %p244_p7 = pnand %p243_p6, %p237_p3 }
   0xe   :  { %247 = shalt.err (!%p244_p7)
}
   0xf   :  { %s251_s22 = smov 128   ;;  %s252_s23 = smov 8  }
  0x10   :  { %22 = dma.hbm_to_vmem [thread:$0]  %s301_s1, 2048, %s17_s13, [#allocation3], %s251_s22, %s251_s22, %s252_s23  }
  0x11   :  { %248 = dma.done.wait [#allocation3], 2048  }
  0x12   :  { %249 = vsyncadd [#allocation3], 4294965248  ;;  %v30_v0 = vld [vmem:[#allocation2] sm:$0xff]  ;;  %v31_v1 = vld [vmem:[#allocation2 + $0x8] sm:$0xff] }
  0x13   :  { %v32_v2 = vld [vmem:[#allocation2 + $0x10] sm:$0xff]  ;;  %v191_v3 = vpack.c.bf16 %v31_v1, %v30_v0  ;;  %v33_v4 = vld [vmem:[#allocation2 + $0x18] sm:$0xff]  ;;  %v34_v6 = vld [vmem:[#allocation2 + $0x20] sm:$0xff] }
  0x14   :  { %v195_v5 = vpack.c.bf16 %v33_v4, %v32_v2  ;;  %v35_v7 = vld [vmem:[#allocation2 + $0x28] sm:$0xff]  ;;  %v28_v9 = vld [vmem:[%s300_s0] sm:$0xff]  ;;  %v36_v10 = vld [vmem:[#allocation2 + $0x30] sm:$0xff] }
  0x15   :  { %192 = vmatprep.subr.bf16.mxu0 %v191_v3  ;;  %v199_v8 = vpack.c.bf16 %v35_v7, %v34_v6  ;;  %v37_v11 = vld [vmem:[#allocation2 + $0x38] sm:$0xff]  ;;  %188 = vmatprep.mubr.f32.mxu0 %v28_v9  ;;  %v38_v13 = vld [vmem:[#allocation2 + $0x40] sm:$0xff]  ;;  %v39_v14 = vld [vmem:[#allocation2 + $0x48] sm:$0xff] }
  0x16   :  { %194 = vmatpush3.bf16.msra.mxu0 %v191_v3  ;;  %v203_v12 = vpack.c.bf16 %v37_v11, %v36_v10  ;;  %v207_v15 = vpack.c.bf16 %v39_v14, %v38_v13  ;;  %v40_v16 = vld [vmem:[#allocation2 + $0x50] sm:$0xff]  ;;  %v41_v17 = vld [vmem:[#allocation2 + $0x58] sm:$0xff]  ;;  %v42_v19 = vld [vmem:[#allocation2 + $0x60] sm:$0xff] }
  0x17   :  { %196 = vmatprep.subr.bf16.mxu0 %v195_v5  ;;  %v211_v18 = vpack.c.bf16 %v41_v17, %v40_v16  ;;  %v43_v20 = vld [vmem:[#allocation2 + $0x68] sm:$0xff]  ;;  %v44_v22 = vld [vmem:[#allocation2 + $0x70] sm:$0xff]  ;;  %v45_v23 = vld [vmem:[#allocation2 + $0x78] sm:$0xff] }
  0x18   :  { %v215_v21 = vpack.c.bf16 %v43_v20, %v42_v19  ;;  %v219_v24 = vpack.c.bf16 %v45_v23, %v44_v22  ;;  %v29_v25 = vld [vmem:[%s300_s0 + $0x8] sm:$0xff]  ;;  %v137_v26 = vld [vmem:[%s302_s2] ss:$0 sm:$0xff] }
  0x1a   :  { %198 = vmatpush3.bf16.msra.mxu0 %v195_v5 }
  0x1b   :  { %200 = vmatprep.subr.bf16.mxu0 %v199_v8 }
  0x1e   :  { %202 = vmatpush3.bf16.msra.mxu0 %v199_v8 }
  0x1f   :  { %204 = vmatprep.subr.bf16.mxu0 %v203_v12 }
  0x22   :  { %206 = vmatpush3.bf16.msra.mxu0 %v203_v12 }
  0x23   :  { %208 = vmatprep.subr.bf16.mxu0 %v207_v15 }
  0x26   :  { %210 = vmatpush3.bf16.msra.mxu0 %v207_v15 }
  0x27   :  { %212 = vmatprep.subr.bf16.mxu0 %v211_v18 }
  0x2a   :  { %214 = vmatpush3.bf16.msra.mxu0 %v211_v18 }
  0x2b   :  { %216 = vmatprep.subr.bf16.mxu0 %v215_v21 }
  0x2e   :  { %218 = vmatpush3.bf16.msra.mxu0 %v215_v21 }
  0x2f   :  { %220 = vmatprep.subr.bf16.mxu0 %v219_v24 }
  0x32   :  { %222 = vmatpush3.bf16.msra.mxu0 %v219_v24 }
  0x35   :  { %189 = vmatmul.mubr.f32.vlgmr.msra.gmra.mrb[0].mxu0 %v29_v25 }
 0x108   :  { %v190_v27 = vpop.f32.mrb[0].mxu0 }
 0x109   :  { %v125_v28 = vadd.f32 %v190_v27, %v137_v26  ;;  %v119_v29 = vpop.f32.mrb[1].mxu0 }
 0x10a   :  { %v120_v30 = vadd.f32 %v137_v26, %v119_v29 }
 0x10b   :  { %v129_v31 = vmax.f32 %v125_v28, 0.0 }
 0x10c   :  { %v128_v32 = vmax.f32 %v120_v30, 0.0 }
 0x10d   :  { %131 = vst [vmem:[%s303_s3 + $0x8] sm:$0xff] %v129_v31 }
 0x10e   :  { %130 = vst [vmem:[%s303_s3] sm:$0xff] %v128_v32 }
 0x10f   :  { %136 = vsyncpa [#allocation3], 1 }

</bundles_post_ra>
